<compile_context>
chip_gen: v6e
topology: v6e:2x2x1
jax: 0.10.0
libtpu: 0.0.40
codegen_flags: <defaults>
</compile_context>

<pallas_src>
import jax
import jax.numpy as jnp
from jax import lax
from jax.experimental import pallas as pl
from jax.experimental.pallas import tpu as pltpu


def mlp_kernel(x_ref, w1_ref, b1_ref, w2_ref, b2_ref, o_ref):
    # x_ref: (B, IN)   w1_ref: (H, IN)   b1_ref: (1, H)
    # w2_ref: (O, H)   b2_ref: (1, O)    o_ref: (B, O)
    # Contract feature axes directly against the PyTorch (out, in) weight
    # layout — same MXU push as a pre-transposed matmul, zero extra cost.
    h = lax.dot_general(
        x_ref[...], w1_ref[...],
        dimension_numbers=(((1,), (1,)), ((), ())),
        preferred_element_type=jnp.float32)
    h = jnp.maximum(h + b1_ref[...], 0.0)              # bias row broadcasts on sublanes
    out = lax.dot_general(
        h, w2_ref[...],
        dimension_numbers=(((1,), (1,)), ((), ())),
        preferred_element_type=jnp.float32)
    o_ref[...] = (out + b2_ref[...]).astype(o_ref.dtype)


@jax.jit
def simple_model_forward(x, w1, b1, w2, b2):
    """Forward pass.

    x:  (B, 5)  float32
    w1: (H, 5), b1: (H,)   -- PyTorch nn.Linear layout
    w2: (O, H), b2: (O,)
    returns (B, O) float32
    """
    B, IN = x.shape
    H = w1.shape[0]
    O = w2.shape[0]

    vmem = pl.BlockSpec(memory_space=pltpu.MemorySpace.VMEM)
    flops = 2 * B * IN * H + 2 * B * H * O
    bytes_accessed = 4 * (x.size + w1.size + b1.size + w2.size + b2.size + B * O)

    return pl.pallas_call(
        mlp_kernel,
        out_shape=jax.ShapeDtypeStruct((B, O), jnp.float32),
        in_specs=[vmem, vmem, vmem, vmem, vmem],
        out_specs=vmem,
        cost_estimate=pl.CostEstimate(
            flops=flops, transcendentals=0, bytes_accessed=bytes_accessed),
    )(x, w1, b1.reshape(1, -1), w2, b2.reshape(1, -1))


def init_params(key, in_features=5, hidden_size=24, out_features=4):
    # nn.Linear-style uniform(-1/sqrt(fan_in), 1/sqrt(fan_in)), PyTorch layout.
    k1, k2, k3, k4 = jax.random.split(key, 4)
    bound1 = 1.0 / jnp.sqrt(in_features)
    bound2 = 1.0 / jnp.sqrt(hidden_size)
    w1 = jax.random.uniform(k1, (hidden_size, in_features), jnp.float32, -bound1, bound1)
    b1 = jax.random.uniform(k2, (hidden_size,), jnp.float32, -bound1, bound1)
    w2 = jax.random.uniform(k3, (out_features, hidden_size), jnp.float32, -bound2, bound2)
    b2 = jax.random.uniform(k4, (out_features,), jnp.float32, -bound2, bound2)
    return w1, b1, w2, b2


if __name__ == "__main__":
    key = jax.random.PRNGKey(0)
    kx, kp = jax.random.split(key)

    B, IN, H, OUT = 8, 5, 24, 4
    x = jax.random.normal(kx, (B, IN), jnp.float32)
    w1, b1, w2, b2 = init_params(kp, IN, H, OUT)

    out = simple_model_forward(x, w1, b1, w2, b2)
    out = jax.block_until_ready(out)

    # Plain-JAX reference (same math as the PyTorch module).
    ref = jnp.maximum(x @ w1.T + b1, 0.0) @ w2.T + b2
    assert out.shape == (B, OUT)
    assert jnp.allclose(out, ref, atol=1e-5, rtol=1e-5)

    print("KERNEL_OK")
</pallas_src>

<mosaic_0001>
module attributes {stable_mosaic.version = 11 : i64} {
  func.func @mlp_kernel(%arg0: memref<8x5xf32, #tpu.memory_space<vmem>>, %arg1: memref<24x5xf32, #tpu.memory_space<vmem>>, %arg2: memref<1x24xf32, #tpu.memory_space<vmem>>, %arg3: memref<4x24xf32, #tpu.memory_space<vmem>>, %arg4: memref<1x4xf32, #tpu.memory_space<vmem>>, %arg5: memref<8x4xf32, #tpu.memory_space<vmem>>) attributes {dimension_semantics = [], scalar_prefetch = 0 : i64, scratch_operands = 0 : i64, tpu.core_type = #tpu.core_type<tc>} {
    %c0 = arith.constant 0 : index
    %c0_0 = arith.constant 0 : index
    %0 = vector.load %arg0[%c0, %c0_0] : memref<8x5xf32, #tpu.memory_space<vmem>>, vector<8x5xf32>
    %c0_1 = arith.constant 0 : index
    %c0_2 = arith.constant 0 : index
    %1 = vector.load %arg1[%c0_1, %c0_2] : memref<24x5xf32, #tpu.memory_space<vmem>>, vector<24x5xf32>
    %cst = arith.constant dense<0.000000e+00> : vector<8x24xf32>
    %2 = tpu.matmul %0, %1, %cst {dimension_numbers = #tpu.dot_dimension_numbers<[1], [1], [0], [0], [0, 0, 1, 0], [], []>} : vector<8x5xf32>, vector<24x5xf32>, vector<8x24xf32> -> vector<8x24xf32>
    %c0_3 = arith.constant 0 : index
    %c0_4 = arith.constant 0 : index
    %3 = vector.load %arg2[%c0_3, %c0_4] : memref<1x24xf32, #tpu.memory_space<vmem>>, vector<1x24xf32>
    %4 = vector.broadcast %3 : vector<1x24xf32> to vector<8x24xf32>
    %5 = arith.addf %2, %4 : vector<8x24xf32>
    %cst_5 = arith.constant 0.000000e+00 : f32
    %6 = vector.broadcast %cst_5 : f32 to vector<8x24xf32>
    %7 = arith.maximumf %5, %6 : vector<8x24xf32>
    %c0_6 = arith.constant 0 : index
    %c0_7 = arith.constant 0 : index
    %8 = vector.load %arg3[%c0_6, %c0_7] : memref<4x24xf32, #tpu.memory_space<vmem>>, vector<4x24xf32>
    %cst_8 = arith.constant dense<0.000000e+00> : vector<8x4xf32>
    %9 = tpu.matmul %7, %8, %cst_8 {dimension_numbers = #tpu.dot_dimension_numbers<[1], [1], [0], [0], [0, 0, 1, 0], [], []>} : vector<8x24xf32>, vector<4x24xf32>, vector<8x4xf32> -> vector<8x4xf32>
    %c0_9 = arith.constant 0 : index
    %c0_10 = arith.constant 0 : index
    %10 = vector.load %arg4[%c0_9, %c0_10] : memref<1x4xf32, #tpu.memory_space<vmem>>, vector<1x4xf32>
    %11 = vector.broadcast %10 : vector<1x4xf32> to vector<8x4xf32>
    %12 = arith.addf %9, %11 : vector<8x4xf32>
    %c0_11 = arith.constant 0 : index
    %c0_12 = arith.constant 0 : index
    %13 = vector.load %arg5[%c0_11, %c0_12] : memref<8x4xf32, #tpu.memory_space<vmem>>, vector<8x4xf32>
    tpu.vector_store %arg5[%c0_11, %c0_12], %12 {strides = array<i32>} : memref<8x4xf32, #tpu.memory_space<vmem>>, vector<8x4xf32>,
    return
  }
}

</mosaic_0001>

<bundles_post_ra>
// kernel: simple_model_forward.1
= control target key start
LH: loop header
LB: loop body
LE: loop exit
PB: predicated region body
PF: predicated region fallthrough
CT: control target
= control target key end

     0   :  { %vm31_vm0 = vcmask 39936   ;;  %v236_v0 = vmov 0.0   ;;  %vm237_vm1 = vmmov 0   ;;  %vm123_vm2 = vcmask 195584   ;;  %s296_s1 = inlined_call_operand.vmem [shape: f32[24,5], index: 1, kind: input, shape index: {}]   ;;  %s297_s0 = inlined_call_operand.vmem [shape: f32[8,5], index: 0, kind: input, shape index: {}]   ;;  %s298_s3 = inlined_call_operand.vmem [shape: f32[4,24], index: 3, kind: input, shape index: {}]   ;;  %s299_s2 = inlined_call_operand.vmem [shape: f32[1,24], index: 2, kind: input, shape index: {}]   ;;  %s300_s4 = inlined_call_operand.vmem [shape: f32[1,4], index: 4, kind: input, shape index: {}]   ;;  %s301_s5 = inlined_call_operand.vmem [shape: f32[8,4], index: 5, kind: output, shape index: {}]  }
   0x1   :  { %220 = vmatprep.subr.mxu0 %v236_v0  ;;  %v23_v1 = vld [vmem:[%s296_s1 + $0x10] sm:$0xff]  ;;  %226 = vmatprep.mubr.msk.f32.mxu0 %vm237_vm1, %v236_v0  ;;  %v22_v2 = vld [vmem:[%s296_s1 + $0x8] sm:$0xff]  ;;  %v21_v3 = vld [vmem:[%s296_s1] sm:$0xff]  ;;  %vm200_vm3 = vcmask 31744  }
   0x2   :  { %221 = vmatpush3.xpose.msk.msra.mxu0 %vm31_vm0, %v23_v1  ;;  %229 = vmatprep.subr.mxu1 %v236_v0  ;;  %v20_v4 = vld [vmem:[%s297_s0] sm:$0xff] }
   0x3   :  { %222 = vmatprep.subr.mxu0 %v236_v0  ;;  %231 = vmatprep.mubr.msk.f32.mxu1 %vm237_vm1, %v236_v0  ;;  %v115_v5 = vld [vmem:[%s298_s3] sm:$0xf] }
   0x4   :  { %230 = vmatpush3.xpose.msk.msra.mxu1 %vm123_vm2, %v115_v5  ;;  %v206_v6 = vld [vmem:[%s299_s2] ss:$0 sm:$0xff] }
   0x5   :  { %v211_v11 = vld [vmem:[%s300_s4] ss:$0 sm:$0xff] }
   0x6   :  { %223 = vmatpush3.xpose.msk.msra.mxu0 %vm31_vm0, %v22_v2 }
   0x7   :  { %224 = vmatprep.subr.mxu0 %v236_v0 }
   0xa   :  { %225 = vmatpush3.xpose.msk.msra.mxu0 %vm31_vm0, %v21_v3 }
   0xd   :  { %227 = vmatmul.mubr.msk.f32.vlgmr.msra.gmra.mxu0 %vm31_vm0, %v20_v4 }
  0xcd   :  { %v110_v7 = vpop.f32.mrf.mxu0 }
  0xce   :  { %v111_v8 = vadd.f32 %v206_v6, %v110_v7 }
  0xcf   :  { %v228_v9 = vpop.f32.mrf.mxu0 }
  0xd0   :  { %v114_v10 = vmax.f32 %v111_v8, 0.0 }
  0xd2   :  { %232 = vmatmul.mubr.msk.f32.vlgmr.msra.gmra.mxu1 %vm123_vm2, %v114_v10 }
 0x192   :  { %v196_v12 = vpop.f32.mrf.mxu1 }
 0x193   :  { %v197_v13 = vadd.f32 %v211_v11, %v196_v12 }
 0x194   :  { %v233_v14 = vpop.f32.mrf.mxu1 }
 0x195   :  { %201 = vst.msk [vmem:[%s301_s5] sm:$0xff] %vm200_vm3, %v197_v13 }

</bundles_post_ra>
